<compile_context>
chip_gen: v5e
topology: v5e:2x2
jax: 0.10.0
libtpu: 0.0.40
codegen_flags: <defaults>
</compile_context>

<pallas_src>
import functools

import jax
import jax.numpy as jnp
from jax.experimental import pallas as pl
from jax.experimental.pallas import tpu as pltpu

_EPS = 1e-6
_RGB_W = (0.299, 0.587, 0.114)
_SOBEL_X = ((-1.0, 0.0, 1.0), (-2.0, 0.0, 2.0), (-1.0, 0.0, 1.0))   # /8 applied below
_SOBEL_Y = ((-1.0, -2.0, -1.0), (0.0, 0.0, 0.0), (1.0, 2.0, 1.0))


def _round_up(x, m):
    return ((x + m - 1) // m) * m


def _pick_tile_rows(h, w_pad, itemsize, max_tile_rows):
    """Largest row tile whose double-buffered blocks + body temporaries fit VMEM."""
    try:
        vmem_cap = int(getattr(pltpu.get_tpu_info(), "vmem_capacity_bytes"))
    except Exception:
        vmem_cap = 64 * 1024 * 1024                     # conservative (v7x) default
    vmem_limit = int(min(0.70 * vmem_cap, vmem_cap - (8 << 20)))
    # 2 inputs x 2 pipeline buffers x (3, R, w_pad) input blocks plus ~10
    # (R, w_pad) f32 temporaries kept live by the body.
    row_bytes = 4 * 3 * w_pad * itemsize + 10 * w_pad * 4
    r_cap = int(vmem_limit * 0.8) // row_bytes
    r_cap = min(r_cap, 1024)
    r_cap = max(8, (r_cap // 8) * 8)
    if max_tile_rows is not None:
        r_cap = max(8, min(r_cap, (max_tile_rows // 8) * 8))
    if h > r_cap:
        rows = r_cap            # multiple of 8; ragged last block handled by masks
        h_arr = h
    else:
        rows = _round_up(h, 8)  # small image: one block, round rows up to 8
        h_arr = rows
    return rows, h_arr, vmem_limit


def _edge_loss_kernel(pred_ref, tgt_ref, acc_ref, carry_ref, *,
                      tile_rows, height, width):
    """One (batch, row-tile) grid step.

    The input block holds image rows [t*R, t*R + R).  The step produces the
    sobel-edge |diff| partial sums for output rows [t*R - 1, t*R + R - 1): the
    one-row lag keeps the 'row below' tap inside the current block, while the
    two rows above come from the carry scratch written by the previous step.
    """
    t = pl.program_id(1)
    r_blk = tile_rows
    _, _, w_blk = pred_ref.shape                      # (3, R, Wpad), batch squeezed

    @pl.when(t == 0)
    def _init():
        acc_ref[...] = jnp.zeros_like(acc_ref)

    # Narrow index vectors / masks, hoisted and shared by both edge maps.
    row = jax.lax.broadcasted_iota(jnp.int32, (r_blk, 1), 0)
    col = jax.lax.broadcasted_iota(jnp.int32, (1, w_blk), 1)
    g_row = row + (t * r_blk - 1)                     # global output row
    is_r0 = row == 0
    is_r1 = row == 1
    top = g_row == 0                                  # replicate p[-1] := p[0]
    bot = g_row == height - 1                         # replicate p[H]  := p[H-1]
    is_c0 = col == 0
    is_cW = col == width - 1
    row_valid = (g_row >= 0) & (g_row < height)
    lane_keep = (col < width).astype(jnp.float32)

    def edge_map(ref, k):
        rr = ref[0].astype(jnp.float32)
        gg = ref[1].astype(jnp.float32)
        bb = ref[2].astype(jnp.float32)
        gray = _RGB_W[0] * rr + _RGB_W[1] * gg + _RGB_W[2] * bb

        # Column stencil with fused replicate padding (lane rolls on the XLU;
        # wrap-around at the image border is replaced by the boundary selects).
        left = jnp.where(is_c0, gray, pltpu.roll(gray, shift=1, axis=1))
        right = jnp.where(is_cW, gray, pltpu.roll(gray, shift=w_blk - 1, axis=1))
        d = right - left                              # [-1, 0, 1] over columns
        s = left + 2.0 * gray + right                 # [ 1, 2, 1] over columns

        # Previous block's last two rows (global rows t*R-2, t*R-1).
        d_m2 = carry_ref[k, 0:1, :]
        d_m1 = carry_ref[k, 1:2, :]
        s_m2 = carry_ref[k, 2:3, :]
        s_m1 = carry_ref[k, 3:4, :]
        # Carry for the next step: this block's last two rows.
        carry_ref[k, 0:2, :] = d[r_blk - 2:r_blk, :]
        carry_ref[k, 2:4, :] = s[r_blk - 2:r_blk, :]

        # Row taps for output row g = t*R - 1 + o (local row o):
        #   tap g+1 -> block row o          tap g   -> block row o-1 (carry at o=0)
        #   tap g-1 -> block row o-2        (carry at o=0, o=1)
        d1 = jnp.where(is_r0, d_m1, pltpu.roll(d, shift=1, axis=0))
        s1 = jnp.where(is_r0, s_m1, pltpu.roll(s, shift=1, axis=0))
        d2 = jnp.where(is_r0, d_m2,
                       jnp.where(is_r1, d_m1, pltpu.roll(d, shift=2, axis=0)))
        s2 = jnp.where(is_r0, s_m2,
                       jnp.where(is_r1, s_m1, pltpu.roll(s, shift=2, axis=0)))
        # Fused replicate padding along rows.
        d2 = jnp.where(top, d1, d2)
        s2 = jnp.where(top, s1, s2)
        d0 = jnp.where(bot, d1, d)
        s0 = jnp.where(bot, s1, s)

        gx = (d2 + 2.0 * d1 + d0) * 0.125
        gy = (s0 - s2) * 0.125
        return jnp.sqrt(gx * gx + gy * gy + _EPS)

    diff = jnp.abs(edge_map(pred_ref, 0) - edge_map(tgt_ref, 1))
    # Kill the t==0 lead-in row, out-of-range bottom rows and any garbage from a
    # ragged last block (a select, so NaNs cannot leak into the accumulator).
    diff = jnp.where(row_valid, diff, 0.0)

    # 8-row vreg-aligned fold (pure VPU adds) into the per-batch accumulator;
    # padded lanes are masked once, on the folded (8, Wpad) partial.
    partial = diff[0:8, :]
    for i in range(8, r_blk, 8):
        partial = partial + diff[i:i + 8, :]
    acc_ref[...] += partial * lane_keep


def edge_loss(prediction, target, *, max_tile_rows=None):
    """EdgeLoss(operator='sobel', loss_function=l1_loss).forward equivalent."""
    B, C, H, W = prediction.shape
    assert C == 3, "rgb_to_grayscale expects 3 input channels"
    assert target.shape == prediction.shape

    w_pad = _round_up(W, 128)                         # lane-dense last dim
    itemsize = jnp.dtype(prediction.dtype).itemsize   # f32 / bf16 / u8 all accepted
    tile_rows, h_arr, vmem_limit = _pick_tile_rows(H, w_pad, itemsize, max_tile_rows)

    # Only wrapper copy, and only when needed: zero-pad W to a lane multiple
    # and/or a small image's H up to a multiple of 8.  Lane-aligned inputs are
    # streamed directly from HBM with no staging copy at all.
    if w_pad != W or h_arr != H:
        pad = ((0, 0), (0, 0), (0, h_arr - H), (0, w_pad - W))
        prediction = jnp.pad(prediction, pad)
        target = jnp.pad(target, pad)

    n_blocks = -(-h_arr // tile_rows)
    last_blk = n_blocks - 1
    # Output rows lag the block by one, so ceil((H+1)/R) steps are needed; the
    # possible extra step re-reads the (clamped) last block, whose DMA is skipped.
    num_steps = -(-(H + 1) // tile_rows)

    kernel = functools.partial(_edge_loss_kernel, tile_rows=tile_rows,
                               height=H, width=W)

    in_block = (pl.Squeezed(), 3, tile_rows, w_pad)
    in_map = lambda b, t: (b, 0, jnp.minimum(t, last_blk), 0)

    partials = pl.pallas_call(
        kernel,
        out_shape=jax.ShapeDtypeStruct((B, 8, w_pad), jnp.float32),
        grid=(B, num_steps),
        in_specs=[
            pl.BlockSpec(in_block, in_map),
            pl.BlockSpec(in_block, in_map),
        ],
        # Per-batch accumulator block, revisited across the sequential tile axis.
        out_specs=pl.BlockSpec((pl.Squeezed(), 8, w_pad), lambda b, t: (b, 0, 0)),
        scratch_shapes=[pltpu.VMEM((2, 8, w_pad), jnp.float32)],   # halo carry
        compiler_params=pltpu.CompilerParams(
            dimension_semantics=("parallel", "arbitrary"),
            vmem_limit_bytes=vmem_limit,
        ),
    )(prediction, target)

    return jnp.sum(partials) / float(B * H * W)       # l1_loss reduction='mean'


def _edge_loss_reference(prediction, target):
    # Pure-JAX reference (same math) for a correctness check.
    def edges(x):
        gray = (_RGB_W[0] * x[:, 0] + _RGB_W[1] * x[:, 1] + _RGB_W[2] * x[:, 2])
        p = jnp.pad(gray, ((0, 0), (1, 1), (1, 1)), mode="edge")
        H, W = gray.shape[-2:]
        gx = jnp.zeros_like(gray)
        gy = jnp.zeros_like(gray)
        for i in range(3):
            for j in range(3):
                tap = p[:, i:i + H, j:j + W]
                gx = gx + (_SOBEL_X[i][j] / 8.0) * tap
                gy = gy + (_SOBEL_Y[i][j] / 8.0) * tap
        return jnp.sqrt(gx * gx + gy * gy + _EPS)

    return jnp.mean(jnp.abs(edges(prediction) - edges(target)))


if __name__ == "__main__":
    key = jax.random.PRNGKey(0)

    def _run_case(shape, max_tile_rows=None):
        k1, k2 = jax.random.split(jax.random.fold_in(key, shape[0] * 1000 + shape[2]))
        pred = jax.random.uniform(k1, shape, dtype=jnp.float32)
        tgt = jax.random.uniform(k2, shape, dtype=jnp.float32)
        got = edge_loss(pred, tgt, max_tile_rows=max_tile_rows)
        jax.block_until_ready(got)
        want = _edge_loss_reference(pred, tgt)
        assert abs(float(got) - float(want)) < 1e-5, (shape, float(got), float(want))

    _run_case((2, 3, 16, 16))                     # single tile
    _run_case((1, 3, 24, 16), max_tile_rows=8)    # multi-tile, R | H (extra tail step)
    _run_case((2, 3, 20, 16), max_tile_rows=8)    # multi-tile, ragged last block

    print("KERNEL_OK")
</pallas_src>

<mosaic_0001>
module attributes {stable_mosaic.version = 11 : i64} {
  func.func @_edge_loss_kernel(%arg0: i32, %arg1: i32, %arg2: memref<1x3x16x128xf32, #tpu.memory_space<vmem>>, %arg3: memref<1x3x16x128xf32, #tpu.memory_space<vmem>>, %arg4: memref<1x8x128xf32, #tpu.memory_space<vmem>>, %arg5: memref<2x8x128xf32, #tpu.memory_space<vmem>>) attributes {dimension_semantics = [#tpu.dimension_semantics<parallel>, #tpu.dimension_semantics<arbitrary>], iteration_bounds = array<i64: 2, 2>, scalar_prefetch = 0 : i64, scratch_operands = 1 : i64, tpu.core_type = #tpu.core_type<tc>, window_params = [{transform_indices = @transform_0, window_bounds = array<i64: 1, 3, 16, 128>}, {transform_indices = @transform_1, window_bounds = array<i64: 1, 3, 16, 128>}, {transform_indices = @transform_2, window_bounds = array<i64: 1, 8, 128>}]} {
    %c0_i32 = arith.constant 0 : i32
    %0 = arith.cmpi eq, %arg1, %c0_i32 : i32
    %1 = arith.extui %0 : i1 to i32
    %c0_i32_0 = arith.constant 0 : i32
    %2 = arith.cmpi ne, %1, %c0_i32_0 : i32
    scf.if %2 {
      %cst_97 = arith.constant 0.000000e+00 : f32
      %255 = vector.broadcast %cst_97 : f32 to vector<8x128xf32>
      %c0_98 = arith.constant 0 : index
      %c0_99 = arith.constant 0 : index
      %c0_100 = arith.constant 0 : index
      %256 = vector.load %arg4[%c0_98, %c0_99, %c0_100] : memref<1x8x128xf32, #tpu.memory_space<vmem>>, vector<1x8x128xf32>
      %257 = vector.shape_cast %256 : vector<1x8x128xf32> to vector<8x128xf32>
      %258 = vector.shape_cast %255 : vector<8x128xf32> to vector<1x8x128xf32>
      tpu.vector_store %arg4[%c0_98, %c0_99, %c0_100], %258 {strides = array<i32>} : memref<1x8x128xf32, #tpu.memory_space<vmem>>, vector<1x8x128xf32>,
    } else {
    }
    %3 = tpu.iota {dimensions = array<i32: 0>} : vector<16x1xi32>
    %4 = tpu.iota {dimensions = array<i32: 1>} : vector<1x128xi32>
    %c16_i32 = arith.constant 16 : i32
    %5 = arith.muli %arg1, %c16_i32 : i32
    %c1_i32 = arith.constant 1 : i32
    %6 = arith.subi %5, %c1_i32 : i32
    %7 = vector.broadcast %6 : i32 to vector<16x1xi32>
    %8 = arith.addi %3, %7 : vector<16x1xi32>
    %c0_i32_1 = arith.constant 0 : i32
    %9 = vector.broadcast %c0_i32_1 : i32 to vector<16x1xi32>
    %10 = arith.cmpi eq, %3, %9 : vector<16x1xi32>
    %c1_i32_2 = arith.constant 1 : i32
    %11 = vector.broadcast %c1_i32_2 : i32 to vector<16x1xi32>
    %12 = arith.cmpi eq, %3, %11 : vector<16x1xi32>
    %c0_i32_3 = arith.constant 0 : i32
    %13 = vector.broadcast %c0_i32_3 : i32 to vector<16x1xi32>
    %14 = arith.cmpi eq, %8, %13 : vector<16x1xi32>
    %c15_i32 = arith.constant 15 : i32
    %15 = vector.broadcast %c15_i32 : i32 to vector<16x1xi32>
    %16 = arith.cmpi eq, %8, %15 : vector<16x1xi32>
    %c0_i32_4 = arith.constant 0 : i32
    %17 = vector.broadcast %c0_i32_4 : i32 to vector<1x128xi32>
    %18 = arith.cmpi eq, %4, %17 : vector<1x128xi32>
    %c15_i32_5 = arith.constant 15 : i32
    %19 = vector.broadcast %c15_i32_5 : i32 to vector<1x128xi32>
    %20 = arith.cmpi eq, %4, %19 : vector<1x128xi32>
    %c0_i32_6 = arith.constant 0 : i32
    %21 = vector.broadcast %c0_i32_6 : i32 to vector<16x1xi32>
    %22 = arith.cmpi sge, %8, %21 : vector<16x1xi32>
    %c16_i32_7 = arith.constant 16 : i32
    %23 = vector.broadcast %c16_i32_7 : i32 to vector<16x1xi32>
    %24 = arith.cmpi slt, %8, %23 : vector<16x1xi32>
    %25 = arith.andi %22, %24 : vector<16x1xi1>
    %c16_i32_8 = arith.constant 16 : i32
    %26 = vector.broadcast %c16_i32_8 : i32 to vector<1x128xi32>
    %27 = arith.cmpi slt, %4, %26 : vector<1x128xi32>
    %28 = arith.extui %27 : vector<1x128xi1> to vector<1x128xi32>
    %29 = arith.sitofp %28 : vector<1x128xi32> to vector<1x128xf32>
    %c0 = arith.constant 0 : index
    %c0_9 = arith.constant 0 : index
    %c0_10 = arith.constant 0 : index
    %c0_11 = arith.constant 0 : index
    %30 = vector.load %arg2[%c0, %c0_9, %c0_10, %c0_11] : memref<1x3x16x128xf32, #tpu.memory_space<vmem>>, vector<1x1x16x128xf32>
    %31 = vector.shape_cast %30 : vector<1x1x16x128xf32> to vector<16x128xf32>
    %c0_12 = arith.constant 0 : index
    %c1 = arith.constant 1 : index
    %c0_13 = arith.constant 0 : index
    %c0_14 = arith.constant 0 : index
    %32 = vector.load %arg2[%c0_12, %c1, %c0_13, %c0_14] : memref<1x3x16x128xf32, #tpu.memory_space<vmem>>, vector<1x1x16x128xf32>
    %33 = vector.shape_cast %32 : vector<1x1x16x128xf32> to vector<16x128xf32>
    %c0_15 = arith.constant 0 : index
    %c2 = arith.constant 2 : index
    %c0_16 = arith.constant 0 : index
    %c0_17 = arith.constant 0 : index
    %34 = vector.load %arg2[%c0_15, %c2, %c0_16, %c0_17] : memref<1x3x16x128xf32, #tpu.memory_space<vmem>>, vector<1x1x16x128xf32>
    %35 = vector.shape_cast %34 : vector<1x1x16x128xf32> to vector<16x128xf32>
    %cst = arith.constant 2.990000e-01 : f32
    %36 = vector.broadcast %cst : f32 to vector<16x128xf32>
    %37 = arith.mulf %36, %31 : vector<16x128xf32>
    %cst_18 = arith.constant 5.870000e-01 : f32
    %38 = vector.broadcast %cst_18 : f32 to vector<16x128xf32>
    %39 = arith.mulf %38, %33 : vector<16x128xf32>
    %40 = arith.addf %37, %39 : vector<16x128xf32>
    %cst_19 = arith.constant 1.140000e-01 : f32
    %41 = vector.broadcast %cst_19 : f32 to vector<16x128xf32>
    %42 = arith.mulf %41, %35 : vector<16x128xf32>
    %43 = arith.addf %40, %42 : vector<16x128xf32>
    %c1_i32_20 = arith.constant 1 : i32
    %44 = tpu.dynamic_rotate %43 by %c1_i32_20 dim 1 : vector<16x128xf32>, i32 -> vector<16x128xf32>
    %45 = vector.shape_cast %18 : vector<1x128xi1> to vector<1x128xi1>
    %46 = vector.broadcast %45 : vector<1x128xi1> to vector<16x128xi1>
    %47 = arith.select %46, %43, %44 : vector<16x128xi1>, vector<16x128xf32>
    %c127_i32 = arith.constant 127 : i32
    %48 = tpu.dynamic_rotate %43 by %c127_i32 dim 1 : vector<16x128xf32>, i32 -> vector<16x128xf32>
    %49 = vector.shape_cast %20 : vector<1x128xi1> to vector<1x128xi1>
    %50 = vector.broadcast %49 : vector<1x128xi1> to vector<16x128xi1>
    %51 = arith.select %50, %43, %48 : vector<16x128xi1>, vector<16x128xf32>
    %52 = arith.subf %51, %47 : vector<16x128xf32>
    %cst_21 = arith.constant 2.000000e+00 : f32
    %53 = vector.broadcast %cst_21 : f32 to vector<16x128xf32>
    %54 = arith.mulf %53, %43 : vector<16x128xf32>
    %55 = arith.addf %47, %54 : vector<16x128xf32>
    %56 = arith.addf %55, %51 : vector<16x128xf32>
    %c0_22 = arith.constant 0 : index
    %c0_23 = arith.constant 0 : index
    %c0_24 = arith.constant 0 : index
    %57 = vector.load %arg5[%c0_22, %c0_23, %c0_24] : memref<2x8x128xf32, #tpu.memory_space<vmem>>, vector<1x1x128xf32>
    %58 = vector.shape_cast %57 : vector<1x1x128xf32> to vector<1x128xf32>
    %c0_25 = arith.constant 0 : index
    %c1_26 = arith.constant 1 : index
    %c0_27 = arith.constant 0 : index
    %59 = vector.load %arg5[%c0_25, %c1_26, %c0_27] : memref<2x8x128xf32, #tpu.memory_space<vmem>>, vector<1x1x128xf32>
    %60 = vector.shape_cast %59 : vector<1x1x128xf32> to vector<1x128xf32>
    %c0_28 = arith.constant 0 : index
    %c2_29 = arith.constant 2 : index
    %c0_30 = arith.constant 0 : index
    %61 = vector.load %arg5[%c0_28, %c2_29, %c0_30] : memref<2x8x128xf32, #tpu.memory_space<vmem>>, vector<1x1x128xf32>
    %62 = vector.shape_cast %61 : vector<1x1x128xf32> to vector<1x128xf32>
    %c0_31 = arith.constant 0 : index
    %c3 = arith.constant 3 : index
    %c0_32 = arith.constant 0 : index
    %63 = vector.load %arg5[%c0_31, %c3, %c0_32] : memref<2x8x128xf32, #tpu.memory_space<vmem>>, vector<1x1x128xf32>
    %64 = vector.shape_cast %63 : vector<1x1x128xf32> to vector<1x128xf32>
    %65 = vector.extract_strided_slice %52 {offsets = [14, 0], sizes = [2, 128], strides = [1, 1]} : vector<16x128xf32> to vector<2x128xf32>
    %c0_33 = arith.constant 0 : index
    %c0_34 = arith.constant 0 : index
    %c0_35 = arith.constant 0 : index
    %66 = vector.load %arg5[%c0_33, %c0_34, %c0_35] : memref<2x8x128xf32, #tpu.memory_space<vmem>>, vector<1x2x128xf32>
    %67 = vector.shape_cast %66 : vector<1x2x128xf32> to vector<2x128xf32>
    %68 = vector.shape_cast %65 : vector<2x128xf32> to vector<1x2x128xf32>
    tpu.vector_store %arg5[%c0_33, %c0_34, %c0_35], %68 {strides = array<i32>} : memref<2x8x128xf32, #tpu.memory_space<vmem>>, vector<1x2x128xf32>,
    %69 = vector.extract_strided_slice %56 {offsets = [14, 0], sizes = [2, 128], strides = [1, 1]} : vector<16x128xf32> to vector<2x128xf32>
    %c0_36 = arith.constant 0 : index
    %c2_37 = arith.constant 2 : index
    %c0_38 = arith.constant 0 : index
    %70 = vector.load %arg5[%c0_36, %c2_37, %c0_38] : memref<2x8x128xf32, #tpu.memory_space<vmem>>, vector<1x2x128xf32>
    %71 = vector.shape_cast %70 : vector<1x2x128xf32> to vector<2x128xf32>
    %72 = vector.shape_cast %69 : vector<2x128xf32> to vector<1x2x128xf32>
    tpu.vector_store %arg5[%c0_36, %c2_37, %c0_38], %72 {strides = array<i32>} : memref<2x8x128xf32, #tpu.memory_space<vmem>>, vector<1x2x128xf32>,
    %c1_i32_39 = arith.constant 1 : i32
    %73 = tpu.dynamic_rotate %52 by %c1_i32_39 dim 0 : vector<16x128xf32>, i32 -> vector<16x128xf32>
    %74 = vector.shape_cast %10 : vector<16x1xi1> to vector<16x1xi1>
    %75 = vector.broadcast %74 : vector<16x1xi1> to vector<16x128xi1>
    %76 = vector.shape_cast %60 : vector<1x128xf32> to vector<1x128xf32>
    %77 = vector.broadcast %76 : vector<1x128xf32> to vector<16x128xf32>
    %78 = arith.select %75, %77, %73 : vector<16x128xi1>, vector<16x128xf32>
    %c1_i32_40 = arith.constant 1 : i32
    %79 = tpu.dynamic_rotate %56 by %c1_i32_40 dim 0 : vector<16x128xf32>, i32 -> vector<16x128xf32>
    %80 = vector.shape_cast %10 : vector<16x1xi1> to vector<16x1xi1>
    %81 = vector.broadcast %80 : vector<16x1xi1> to vector<16x128xi1>
    %82 = vector.shape_cast %64 : vector<1x128xf32> to vector<1x128xf32>
    %83 = vector.broadcast %82 : vector<1x128xf32> to vector<16x128xf32>
    %84 = arith.select %81, %83, %79 : vector<16x128xi1>, vector<16x128xf32>
    %c2_i32 = arith.constant 2 : i32
    %85 = tpu.dynamic_rotate %52 by %c2_i32 dim 0 : vector<16x128xf32>, i32 -> vector<16x128xf32>
    %86 = vector.shape_cast %12 : vector<16x1xi1> to vector<16x1xi1>
    %87 = vector.broadcast %86 : vector<16x1xi1> to vector<16x128xi1>
    %88 = vector.shape_cast %60 : vector<1x128xf32> to vector<1x128xf32>
    %89 = vector.broadcast %88 : vector<1x128xf32> to vector<16x128xf32>
    %90 = arith.select %87, %89, %85 : vector<16x128xi1>, vector<16x128xf32>
    %91 = vector.shape_cast %10 : vector<16x1xi1> to vector<16x1xi1>
    %92 = vector.broadcast %91 : vector<16x1xi1> to vector<16x128xi1>
    %93 = vector.shape_cast %58 : vector<1x128xf32> to vector<1x128xf32>
    %94 = vector.broadcast %93 : vector<1x128xf32> to vector<16x128xf32>
    %95 = arith.select %92, %94, %90 : vector<16x128xi1>, vector<16x128xf32>
    %c2_i32_41 = arith.constant 2 : i32
    %96 = tpu.dynamic_rotate %56 by %c2_i32_41 dim 0 : vector<16x128xf32>, i32 -> vector<16x128xf32>
    %97 = vector.shape_cast %12 : vector<16x1xi1> to vector<16x1xi1>
    %98 = vector.broadcast %97 : vector<16x1xi1> to vector<16x128xi1>
    %99 = vector.shape_cast %64 : vector<1x128xf32> to vector<1x128xf32>
    %100 = vector.broadcast %99 : vector<1x128xf32> to vector<16x128xf32>
    %101 = arith.select %98, %100, %96 : vector<16x128xi1>, vector<16x128xf32>
    %102 = vector.shape_cast %10 : vector<16x1xi1> to vector<16x1xi1>
    %103 = vector.broadcast %102 : vector<16x1xi1> to vector<16x128xi1>
    %104 = vector.shape_cast %62 : vector<1x128xf32> to vector<1x128xf32>
    %105 = vector.broadcast %104 : vector<1x128xf32> to vector<16x128xf32>
    %106 = arith.select %103, %105, %101 : vector<16x128xi1>, vector<16x128xf32>
    %107 = vector.shape_cast %14 : vector<16x1xi1> to vector<16x1xi1>
    %108 = vector.broadcast %107 : vector<16x1xi1> to vector<16x128xi1>
    %109 = arith.select %108, %78, %95 : vector<16x128xi1>, vector<16x128xf32>
    %110 = vector.shape_cast %14 : vector<16x1xi1> to vector<16x1xi1>
    %111 = vector.broadcast %110 : vector<16x1xi1> to vector<16x128xi1>
    %112 = arith.select %111, %84, %106 : vector<16x128xi1>, vector<16x128xf32>
    %113 = vector.shape_cast %16 : vector<16x1xi1> to vector<16x1xi1>
    %114 = vector.broadcast %113 : vector<16x1xi1> to vector<16x128xi1>
    %115 = arith.select %114, %78, %52 : vector<16x128xi1>, vector<16x128xf32>
    %116 = vector.shape_cast %16 : vector<16x1xi1> to vector<16x1xi1>
    %117 = vector.broadcast %116 : vector<16x1xi1> to vector<16x128xi1>
    %118 = arith.select %117, %84, %56 : vector<16x128xi1>, vector<16x128xf32>
    %cst_42 = arith.constant 2.000000e+00 : f32
    %119 = vector.broadcast %cst_42 : f32 to vector<16x128xf32>
    %120 = arith.mulf %119, %78 : vector<16x128xf32>
    %121 = arith.addf %109, %120 : vector<16x128xf32>
    %122 = arith.addf %121, %115 : vector<16x128xf32>
    %cst_43 = arith.constant 1.250000e-01 : f32
    %123 = vector.broadcast %cst_43 : f32 to vector<16x128xf32>
    %124 = arith.mulf %122, %123 : vector<16x128xf32>
    %125 = arith.subf %118, %112 : vector<16x128xf32>
    %cst_44 = arith.constant 1.250000e-01 : f32
    %126 = vector.broadcast %cst_44 : f32 to vector<16x128xf32>
    %127 = arith.mulf %125, %126 : vector<16x128xf32>
    %128 = arith.mulf %124, %124 : vector<16x128xf32>
    %129 = arith.mulf %127, %127 : vector<16x128xf32>
    %130 = arith.addf %128, %129 : vector<16x128xf32>
    %cst_45 = arith.constant 9.99999997E-7 : f32
    %131 = vector.broadcast %cst_45 : f32 to vector<16x128xf32>
    %132 = arith.addf %130, %131 : vector<16x128xf32>
    %133 = math.sqrt %132 : vector<16x128xf32>
    %c0_46 = arith.constant 0 : index
    %c0_47 = arith.constant 0 : index
    %c0_48 = arith.constant 0 : index
    %c0_49 = arith.constant 0 : index
    %134 = vector.load %arg3[%c0_46, %c0_47, %c0_48, %c0_49] : memref<1x3x16x128xf32, #tpu.memory_space<vmem>>, vector<1x1x16x128xf32>
    %135 = vector.shape_cast %134 : vector<1x1x16x128xf32> to vector<16x128xf32>
    %c0_50 = arith.constant 0 : index
    %c1_51 = arith.constant 1 : index
    %c0_52 = arith.constant 0 : index
    %c0_53 = arith.constant 0 : index
    %136 = vector.load %arg3[%c0_50, %c1_51, %c0_52, %c0_53] : memref<1x3x16x128xf32, #tpu.memory_space<vmem>>, vector<1x1x16x128xf32>
    %137 = vector.shape_cast %136 : vector<1x1x16x128xf32> to vector<16x128xf32>
    %c0_54 = arith.constant 0 : index
    %c2_55 = arith.constant 2 : index
    %c0_56 = arith.constant 0 : index
    %c0_57 = arith.constant 0 : index
    %138 = vector.load %arg3[%c0_54, %c2_55, %c0_56, %c0_57] : memref<1x3x16x128xf32, #tpu.memory_space<vmem>>, vector<1x1x16x128xf32>
    %139 = vector.shape_cast %138 : vector<1x1x16x128xf32> to vector<16x128xf32>
    %cst_58 = arith.constant 2.990000e-01 : f32
    %140 = vector.broadcast %cst_58 : f32 to vector<16x128xf32>
    %141 = arith.mulf %140, %135 : vector<16x128xf32>
    %cst_59 = arith.constant 5.870000e-01 : f32
    %142 = vector.broadcast %cst_59 : f32 to vector<16x128xf32>
    %143 = arith.mulf %142, %137 : vector<16x128xf32>
    %144 = arith.addf %141, %143 : vector<16x128xf32>
    %cst_60 = arith.constant 1.140000e-01 : f32
    %145 = vector.broadcast %cst_60 : f32 to vector<16x128xf32>
    %146 = arith.mulf %145, %139 : vector<16x128xf32>
    %147 = arith.addf %144, %146 : vector<16x128xf32>
    %c1_i32_61 = arith.constant 1 : i32
    %148 = tpu.dynamic_rotate %147 by %c1_i32_61 dim 1 : vector<16x128xf32>, i32 -> vector<16x128xf32>
    %149 = vector.shape_cast %18 : vector<1x128xi1> to vector<1x128xi1>
    %150 = vector.broadcast %149 : vector<1x128xi1> to vector<16x128xi1>
    %151 = arith.select %150, %147, %148 : vector<16x128xi1>, vector<16x128xf32>
    %c127_i32_62 = arith.constant 127 : i32
    %152 = tpu.dynamic_rotate %147 by %c127_i32_62 dim 1 : vector<16x128xf32>, i32 -> vector<16x128xf32>
    %153 = vector.shape_cast %20 : vector<1x128xi1> to vector<1x128xi1>
    %154 = vector.broadcast %153 : vector<1x128xi1> to vector<16x128xi1>
    %155 = arith.select %154, %147, %152 : vector<16x128xi1>, vector<16x128xf32>
    %156 = arith.subf %155, %151 : vector<16x128xf32>
    %cst_63 = arith.constant 2.000000e+00 : f32
    %157 = vector.broadcast %cst_63 : f32 to vector<16x128xf32>
    %158 = arith.mulf %157, %147 : vector<16x128xf32>
    %159 = arith.addf %151, %158 : vector<16x128xf32>
    %160 = arith.addf %159, %155 : vector<16x128xf32>
    %c1_64 = arith.constant 1 : index
    %c0_65 = arith.constant 0 : index
    %c0_66 = arith.constant 0 : index
    %161 = vector.load %arg5[%c1_64, %c0_65, %c0_66] : memref<2x8x128xf32, #tpu.memory_space<vmem>>, vector<1x1x128xf32>
    %162 = vector.shape_cast %161 : vector<1x1x128xf32> to vector<1x128xf32>
    %c1_67 = arith.constant 1 : index
    %c1_68 = arith.constant 1 : index
    %c0_69 = arith.constant 0 : index
    %163 = vector.load %arg5[%c1_67, %c1_68, %c0_69] : memref<2x8x128xf32, #tpu.memory_space<vmem>>, vector<1x1x128xf32>
    %164 = vector.shape_cast %163 : vector<1x1x128xf32> to vector<1x128xf32>
    %c1_70 = arith.constant 1 : index
    %c2_71 = arith.constant 2 : index
    %c0_72 = arith.constant 0 : index
    %165 = vector.load %arg5[%c1_70, %c2_71, %c0_72] : memref<2x8x128xf32, #tpu.memory_space<vmem>>, vector<1x1x128xf32>
    %166 = vector.shape_cast %165 : vector<1x1x128xf32> to vector<1x128xf32>
    %c1_73 = arith.constant 1 : index
    %c3_74 = arith.constant 3 : index
    %c0_75 = arith.constant 0 : index
    %167 = vector.load %arg5[%c1_73, %c3_74, %c0_75] : memref<2x8x128xf32, #tpu.memory_space<vmem>>, vector<1x1x128xf32>
    %168 = vector.shape_cast %167 : vector<1x1x128xf32> to vector<1x128xf32>
    %169 = vector.extract_strided_slice %156 {offsets = [14, 0], sizes = [2, 128], strides = [1, 1]} : vector<16x128xf32> to vector<2x128xf32>
    %c1_76 = arith.constant 1 : index
    %c0_77 = arith.constant 0 : index
    %c0_78 = arith.constant 0 : index
    %170 = vector.load %arg5[%c1_76, %c0_77, %c0_78] : memref<2x8x128xf32, #tpu.memory_space<vmem>>, vector<1x2x128xf32>
    %171 = vector.shape_cast %170 : vector<1x2x128xf32> to vector<2x128xf32>
    %172 = vector.shape_cast %169 : vector<2x128xf32> to vector<1x2x128xf32>
    tpu.vector_store %arg5[%c1_76, %c0_77, %c0_78], %172 {strides = array<i32>} : memref<2x8x128xf32, #tpu.memory_space<vmem>>, vector<1x2x128xf32>,
    %173 = vector.extract_strided_slice %160 {offsets = [14, 0], sizes = [2, 128], strides = [1, 1]} : vector<16x128xf32> to vector<2x128xf32>
    %c1_79 = arith.constant 1 : index
    %c2_80 = arith.constant 2 : index
    %c0_81 = arith.constant 0 : index
    %174 = vector.load %arg5[%c1_79, %c2_80, %c0_81] : memref<2x8x128xf32, #tpu.memory_space<vmem>>, vector<1x2x128xf32>
    %175 = vector.shape_cast %174 : vector<1x2x128xf32> to vector<2x128xf32>
    %176 = vector.shape_cast %173 : vector<2x128xf32> to vector<1x2x128xf32>
    tpu.vector_store %arg5[%c1_79, %c2_80, %c0_81], %176 {strides = array<i32>} : memref<2x8x128xf32, #tpu.memory_space<vmem>>, vector<1x2x128xf32>,
    %c1_i32_82 = arith.constant 1 : i32
    %177 = tpu.dynamic_rotate %156 by %c1_i32_82 dim 0 : vector<16x128xf32>, i32 -> vector<16x128xf32>
    %178 = vector.shape_cast %10 : vector<16x1xi1> to vector<16x1xi1>
    %179 = vector.broadcast %178 : vector<16x1xi1> to vector<16x128xi1>
    %180 = vector.shape_cast %164 : vector<1x128xf32> to vector<1x128xf32>
    %181 = vector.broadcast %180 : vector<1x128xf32> to vector<16x128xf32>
    %182 = arith.select %179, %181, %177 : vector<16x128xi1>, vector<16x128xf32>
    %c1_i32_83 = arith.constant 1 : i32
    %183 = tpu.dynamic_rotate %160 by %c1_i32_83 dim 0 : vector<16x128xf32>, i32 -> vector<16x128xf32>
    %184 = vector.shape_cast %10 : vector<16x1xi1> to vector<16x1xi1>
    %185 = vector.broadcast %184 : vector<16x1xi1> to vector<16x128xi1>
    %186 = vector.shape_cast %168 : vector<1x128xf32> to vector<1x128xf32>
    %187 = vector.broadcast %186 : vector<1x128xf32> to vector<16x128xf32>
    %188 = arith.select %185, %187, %183 : vector<16x128xi1>, vector<16x128xf32>
    %c2_i32_84 = arith.constant 2 : i32
    %189 = tpu.dynamic_rotate %156 by %c2_i32_84 dim 0 : vector<16x128xf32>, i32 -> vector<16x128xf32>
    %190 = vector.shape_cast %12 : vector<16x1xi1> to vector<16x1xi1>
    %191 = vector.broadcast %190 : vector<16x1xi1> to vector<16x128xi1>
    %192 = vector.shape_cast %164 : vector<1x128xf32> to vector<1x128xf32>
    %193 = vector.broadcast %192 : vector<1x128xf32> to vector<16x128xf32>
    %194 = arith.select %191, %193, %189 : vector<16x128xi1>, vector<16x128xf32>
    %195 = vector.shape_cast %10 : vector<16x1xi1> to vector<16x1xi1>
    %196 = vector.broadcast %195 : vector<16x1xi1> to vector<16x128xi1>
    %197 = vector.shape_cast %162 : vector<1x128xf32> to vector<1x128xf32>
    %198 = vector.broadcast %197 : vector<1x128xf32> to vector<16x128xf32>
    %199 = arith.select %196, %198, %194 : vector<16x128xi1>, vector<16x128xf32>
    %c2_i32_85 = arith.constant 2 : i32
    %200 = tpu.dynamic_rotate %160 by %c2_i32_85 dim 0 : vector<16x128xf32>, i32 -> vector<16x128xf32>
    %201 = vector.shape_cast %12 : vector<16x1xi1> to vector<16x1xi1>
    %202 = vector.broadcast %201 : vector<16x1xi1> to vector<16x128xi1>
    %203 = vector.shape_cast %168 : vector<1x128xf32> to vector<1x128xf32>
    %204 = vector.broadcast %203 : vector<1x128xf32> to vector<16x128xf32>
    %205 = arith.select %202, %204, %200 : vector<16x128xi1>, vector<16x128xf32>
    %206 = vector.shape_cast %10 : vector<16x1xi1> to vector<16x1xi1>
    %207 = vector.broadcast %206 : vector<16x1xi1> to vector<16x128xi1>
    %208 = vector.shape_cast %166 : vector<1x128xf32> to vector<1x128xf32>
    %209 = vector.broadcast %208 : vector<1x128xf32> to vector<16x128xf32>
    %210 = arith.select %207, %209, %205 : vector<16x128xi1>, vector<16x128xf32>
    %211 = vector.shape_cast %14 : vector<16x1xi1> to vector<16x1xi1>
    %212 = vector.broadcast %211 : vector<16x1xi1> to vector<16x128xi1>
    %213 = arith.select %212, %182, %199 : vector<16x128xi1>, vector<16x128xf32>
    %214 = vector.shape_cast %14 : vector<16x1xi1> to vector<16x1xi1>
    %215 = vector.broadcast %214 : vector<16x1xi1> to vector<16x128xi1>
    %216 = arith.select %215, %188, %210 : vector<16x128xi1>, vector<16x128xf32>
    %217 = vector.shape_cast %16 : vector<16x1xi1> to vector<16x1xi1>
    %218 = vector.broadcast %217 : vector<16x1xi1> to vector<16x128xi1>
    %219 = arith.select %218, %182, %156 : vector<16x128xi1>, vector<16x128xf32>
    %220 = vector.shape_cast %16 : vector<16x1xi1> to vector<16x1xi1>
    %221 = vector.broadcast %220 : vector<16x1xi1> to vector<16x128xi1>
    %222 = arith.select %221, %188, %160 : vector<16x128xi1>, vector<16x128xf32>
    %cst_86 = arith.constant 2.000000e+00 : f32
    %223 = vector.broadcast %cst_86 : f32 to vector<16x128xf32>
    %224 = arith.mulf %223, %182 : vector<16x128xf32>
    %225 = arith.addf %213, %224 : vector<16x128xf32>
    %226 = arith.addf %225, %219 : vector<16x128xf32>
    %cst_87 = arith.constant 1.250000e-01 : f32
    %227 = vector.broadcast %cst_87 : f32 to vector<16x128xf32>
    %228 = arith.mulf %226, %227 : vector<16x128xf32>
    %229 = arith.subf %222, %216 : vector<16x128xf32>
    %cst_88 = arith.constant 1.250000e-01 : f32
    %230 = vector.broadcast %cst_88 : f32 to vector<16x128xf32>
    %231 = arith.mulf %229, %230 : vector<16x128xf32>
    %232 = arith.mulf %228, %228 : vector<16x128xf32>
    %233 = arith.mulf %231, %231 : vector<16x128xf32>
    %234 = arith.addf %232, %233 : vector<16x128xf32>
    %cst_89 = arith.constant 9.99999997E-7 : f32
    %235 = vector.broadcast %cst_89 : f32 to vector<16x128xf32>
    %236 = arith.addf %234, %235 : vector<16x128xf32>
    %237 = math.sqrt %236 : vector<16x128xf32>
    %238 = arith.subf %133, %237 : vector<16x128xf32>
    %239 = math.absf %238 : vector<16x128xf32>
    %cst_90 = arith.constant 0.000000e+00 : f32
    %240 = vector.shape_cast %25 : vector<16x1xi1> to vector<16x1xi1>
    %241 = vector.broadcast %240 : vector<16x1xi1> to vector<16x128xi1>
    %242 = vector.broadcast %cst_90 : f32 to vector<16x128xf32>
    %243 = arith.select %241, %239, %242 : vector<16x128xi1>, vector<16x128xf32>
    %244 = vector.extract_strided_slice %243 {offsets = [0, 0], sizes = [8, 128], strides = [1, 1]} : vector<16x128xf32> to vector<8x128xf32>
    %245 = vector.extract_strided_slice %243 {offsets = [8, 0], sizes = [8, 128], strides = [1, 1]} : vector<16x128xf32> to vector<8x128xf32>
    %246 = arith.addf %244, %245 : vector<8x128xf32>
    %c0_91 = arith.constant 0 : index
    %c0_92 = arith.constant 0 : index
    %c0_93 = arith.constant 0 : index
    %247 = vector.load %arg4[%c0_91, %c0_92, %c0_93] : memref<1x8x128xf32, #tpu.memory_space<vmem>>, vector<1x8x128xf32>
    %248 = vector.shape_cast %247 : vector<1x8x128xf32> to vector<8x128xf32>
    %249 = vector.broadcast %29 : vector<1x128xf32> to vector<8x128xf32>
    %250 = arith.mulf %246, %249 : vector<8x128xf32>
    %251 = arith.addf %248, %250 : vector<8x128xf32>
    %c0_94 = arith.constant 0 : index
    %c0_95 = arith.constant 0 : index
    %c0_96 = arith.constant 0 : index
    %252 = vector.load %arg4[%c0_94, %c0_95, %c0_96] : memref<1x8x128xf32, #tpu.memory_space<vmem>>, vector<1x8x128xf32>
    %253 = vector.shape_cast %252 : vector<1x8x128xf32> to vector<8x128xf32>
    %254 = vector.shape_cast %251 : vector<8x128xf32> to vector<1x8x128xf32>
    tpu.vector_store %arg4[%c0_94, %c0_95, %c0_96], %254 {strides = array<i32>} : memref<1x8x128xf32, #tpu.memory_space<vmem>>, vector<1x8x128xf32>,
    return
  }
  func.func @transform_0(%arg0: i32, %arg1: i32) -> (i32, i32, i32, i32) {
    %c0_i32 = arith.constant 0 : i32
    %0 = arith.minsi %arg1, %c0_i32 : i32
    %c0_i32_0 = arith.constant 0 : i32
    %c0_i32_1 = arith.constant 0 : i32
    %c0_i32_2 = arith.constant 0 : i32
    return %arg0, %c0_i32_0, %0, %c0_i32_1 : i32, i32, i32, i32
  }
  func.func @transform_1(%arg0: i32, %arg1: i32) -> (i32, i32, i32, i32) {
    %c0_i32 = arith.constant 0 : i32
    %0 = arith.minsi %arg1, %c0_i32 : i32
    %c0_i32_0 = arith.constant 0 : i32
    %c0_i32_1 = arith.constant 0 : i32
    %c0_i32_2 = arith.constant 0 : i32
    return %arg0, %c0_i32_0, %0, %c0_i32_1 : i32, i32, i32, i32
  }
  func.func @transform_2(%arg0: i32, %arg1: i32) -> (i32, i32, i32) {
    %c0_i32 = arith.constant 0 : i32
    %c0_i32_0 = arith.constant 0 : i32
    %c0_i32_1 = arith.constant 0 : i32
    return %arg0, %c0_i32, %c0_i32_0 : i32, i32, i32
  }
}

</mosaic_0001>

<bundles_post_ra>
// kernel: tpu_custom_call.1
= control target key start
LH: loop header
LB: loop body
LE: loop exit
PB: predicated region body
PF: predicated region fallthrough
CT: control target
= control target key end

     0   :  { %s1483_s0 = inlined_call_operand.hbm [shape: f32[2,3,16,128], index: 0, kind: input, shape index: {}]   ;;  %s1484_s1 = inlined_call_operand.hbm [shape: f32[2,3,16,128], index: 1, kind: input, shape index: {}]   ;;  %s1485_s2 = inlined_call_operand.hbm [shape: f32[2,8,128], index: 2, kind: output, shape index: {}]  }
   0x1   :  { %1490 = sst [smem:[#allocation19_spill]] %s1483_s0 }
   0x2   :  { %7 = vsyncpa [#allocation4], 0 }
   0x3   :  { %9 = vsyncpa [#allocation4 + $0x1], 0 }
   0x4   :  { %10 = vsyncpa [#allocation7], 0 }
   0x5   :  { %12 = vsyncpa [#allocation7 + $0x1], 0 }
   0x6   :  { %13 = vsyncpa [#allocation5], 0 }
   0x7   :  { %15 = vsyncpa [#allocation5 + $0x1], 0  ;;  %s1066_s9 = smov 0   ;;  %s1068_s10 = smov 0  }
   0x8   :  { %s1070_s11 = smov 0   ;;  %s1072_s12 = smov 0  }
   0x9   :  { %s1074_s13 = smov 0   ;;  %s1076_s14 = smov 0  }
   0xa   :  { %s1078_s15 = smov 0   ;;  %s1080_s16 = smov 0  }
   0xb   :  { %s1082_s17 = smov 0   ;;  %s1084_s18 = smov 0  }
   0xc   :  { %s1086_s19 = smov 0  }
   0xd LB: > { %1491 = sst [smem:[#allocation12_spill]] %s1023_s14  ;;  %s698_s20 = sadd.s32 4294967295, %s1043_s19   ;;  %s1043_s19 = sphi %s1086_s19, %s21_s19   ;;  %s1039_s18 = sphi %s1084_s18, %s1511_s18   ;;  %s1035_s17 = sphi %s1082_s17, %s1510_s17   ;;  %s1031_s16 = sphi %s1080_s16, %s1509_s16   ;;  %s1027_s15 = sphi %s1078_s15, %s1508_s15   ;;  %s1023_s14 = sphi %s1076_s14, %s1507_s14   ;;  %s1019_s13 = sphi %s1074_s13, %s1516_s13   ;;  %s1015_s12 = sphi %s1072_s12, %s1515_s12   ;;  %s1011_s11 = sphi %s1070_s11, %s1514_s11   ;;  %s1007_s10 = sphi %s1068_s10, %s1513_s10   ;;  %s1003_s9 = sphi %s1066_s9, %s1512_s9  }
   0xe   : > { %1492 = sst [smem:[#allocation13_spill]] %s1035_s17  ;;  %s699_s21 = sadd.s32 4294967294, %s1043_s19  }
   0xf   : > { %1493 = sst [smem:[#allocation14_spill]] %s1039_s18  ;;  %s30_s22 = sadd.s32 1, %s1035_s17 }
  0x10   : > { %s33_s23 = sadd.s32 1, %s1039_s18  ;;  %p31_p0 = scmp.ge.s32.totalorder %s30_s22, 2 }
  0x11   : > { %s46_s24 = sadd.s32 1, %s1023_s14  ;;  %p53_p1 = scmp.ne.s32.totalorder %s1023_s14, %s1019_s13 }
  0x12   : > { %s1518_s22 = smov (%p31_p0, %s30_s22), 0  ;;  %s1520_s23 = smov (!%p31_p0, %s33_s23), %s1039_s18 }
  0x13   : > { %1494 = sst [smem:[#allocation15_spill]] %s1518_s22  ;;  %p35_p2 = scmp.ge.s32.totalorder %s1520_s23, 2 }
  0x14   : > { %p54_p3 = scmp.eq.s32.totalorder %s1043_s19, 0  ;;  %p59_p4 = scmp.ne.s32.totalorder %s1019_s13, %s1015_s12 }
  0x15   : > { %s1522_s23 = smov (%p35_p2, %s1520_s23), 0  ;;  %p60_p6 = scmp.eq.s32.totalorder %s698_s20, 0 }
  0x16   : > { %1495 = sst [smem:[#allocation16_spill]] %s1522_s23  ;;  %s41_s25 = ssub.s32 %s1039_s18, %s1522_s23 }
  0x17   : > { %p1135_p5 = por %p54_p3, %p53_p1  ;;  %p102_p7 = scmp.eq.s32.totalorder %s41_s25, 0 }
  0x18   : > { %p1139_p8 = por %p60_p6, %p59_p4  ;;  %s104_s28 = sadd.s32 1, %s1011_s11 }
  0x19   : > { %p114_p9 = scmp.ne.s32.totalorder %s1011_s11, %s1007_s10  ;;  %p115_p10 = scmp.eq.s32.totalorder %s698_s20, 3 }
  0x1a   : > { %s1147_s29 = scalar_select %p102_p7, %s1023_s14, %s46_s24  }
  0x1b   : > { %s1150_s30 = scalar_select %p102_p7, %s1011_s11, %s104_s28  }
  0x1c   : > { %1498 = sst [smem:[#allocation17_spill]] %s1147_s29  ;;  %p120_p11 = scmp.ne.s32.totalorder %s1007_s10, %s1003_s9 }
  0x1d   : > { %1499 = sst [smem:[#allocation18_spill]] %s1150_s30  ;;  %p121_p12 = scmp.eq.s32.totalorder %s699_s21, 3 }
  0x1e   : > { %p1154_p13 = por %p115_p10, %p114_p9  ;;  %p746_p0 = scmp.lt.s32.totalorder %s1043_s19, 4 }
  0x1f   : > { %p1159_p1 = por %p121_p12, %p120_p11  ;;  %s1164_s5 = sand.u32 1, %s1023_s14  }
  0x20   : > { %s724_s6 = smul.u32 48, %s1164_s5  ;;  %p1169_p2 = pnand %p746_p0, %p1135_p5 }
  0x21   : > { %s1000_s20 = smul.u32 48, %s1039_s18  ;;  %s1503_s0 = sld [smem:[#allocation19_spill]] }
  0x22   : > { %s145_s8 = scalar_lea.vmem [#allocation3], %s724_s6  ;;  %s142_s23 = scalar_lea.sflag [#allocation4], %s1164_s5 }
  0x23   : > { %s157_s12 = sshll.u32 %s145_s8, 4  ;;  %p860_p4 = pneg %p1169_p2  ;;  %s158_s12 = int_to_ptr.vmem [resolvable:$true] %s157_s12 }
  0x27   : > { %s154_s25 = scalar_lea.hbm %s1503_s0, %s1000_s20  ;;  %s863_s17 = scalar_lea.hbm %s1503_s0, 96 }
  0x28   : > { %s155_s28 = sshll.u32 %s154_s25, 4  ;;  %s156_s28 = int_to_ptr.hbm [resolvable:$true] %s155_s28 }
  0x29   : > { %s856_s22 = sshra.s32 %s156_s28, 4  ;;  %s857_s22 = int_to_ptr.hbm [resolvable:$true] %s856_s22 }
  0x2a   : > { %s858_s26 = scalar_lea.hbm %s857_s22, 48 }
  0x2b   : > { %p859_p3 = scmp.ne.s32.totalorder %s857_s22, %s858_s26  ;;  %p865_p7 = scmp.lt.s32.totalorder %s863_s17, %s858_s26 }
  0x2d   : > { %p861_p5 = pnand %p860_p4, %p859_p3 }
  0x2f   : > { %p862_p6 = pneg %p861_p5 }
  0x31   : > { %p867_p9 = pnand %p865_p7, %p862_p6 }
  0x33   : > { %870 = shalt.err (!%p867_p9)
}
  0x34   : > { %s1045_s21 = smov 128   ;;  %s1046_s24 = smov 8  }
  0x35   : > { %738 = dma.hbm_to_vmem [thread:$0]  (!%p1169_p2), %s156_s28, 768, %s158_s12, %s142_s23, %s1045_s21, %s1045_s21, %s1046_s24  }
  0x36   : > { %p706_p10 = scmp.ge.s32.totalorder %s1043_s19, 1  ;;  %p191_p11 = scmp.lt.s32.totalorder %s1043_s19, 5 }
  0x37   : > { %s180_s17 = scalar_lea.hbm %s1484_s1, %s1000_s20  ;;  %s171_s8 = scalar_lea.vmem [#allocation6], %s724_s6 }
  0x38   : > { %p1190_p12 = pnand %p706_p10, %p191_p11  ;;  %s181_s26 = sshll.u32 %s180_s17, 4  ;;  %s182_s26 = int_to_ptr.hbm [resolvable:$true] %s181_s26 }
  0x39   : > { %s183_s0 = sshll.u32 %s171_s8, 4  ;;  %s168_s29 = scalar_lea.sflag [#allocation7], %s1164_s5  ;;  %s184_s0 = int_to_ptr.vmem [resolvable:$true] %s183_s0 }
  0x3a   : > { %s886_s14 = sshra.s32 %s182_s26, 4  ;;  %s893_s28 = scalar_lea.hbm %s1484_s1, 96  ;;  %s887_s14 = int_to_ptr.hbm [resolvable:$true] %s886_s14 }
  0x3b   : > { %s888_s30 = scalar_lea.hbm %s887_s14, 48 }
  0x3c   : > { %p889_p0 = scmp.ne.s32.totalorder %s887_s14, %s888_s30  ;;  %p895_p6 = scmp.lt.s32.totalorder %s893_s28, %s888_s30 }
  0x3e   : > { %p891_p3 = pnand %p889_p0, %p860_p4 }
  0x40   : > { %p892_p5 = pneg %p891_p3 }
  0x42   : > { %p897_p7 = pnand %p895_p6, %p892_p5 }
  0x44   : > { %900 = shalt.err (!%p897_p7)
}
  0x45   : > { %741 = dma.hbm_to_vmem [thread:$0]  (!%p1169_p2), %s182_s26, 768, %s184_s0, %s168_s29, %s1045_s21, %s1045_s21, %s1046_s24  }
  0x46   : > { %195 = sbr.rel (%p1190_p12) target bundleno = 291 (0x123), region = 28  ;;  %s197_s14 = sand.u32 (!%p1190_p12), 1, %s1019_s13  }
  0x47   : > { %s728_s5 = smul.u32 (!%p1190_p12), 48, %s197_s14  ;;  %s198_s6 = scalar_lea.sflag (!%p1190_p12), [#allocation4], %s197_s14 }
  0x49   : > { %s201_s20 = scalar_lea.vmem (!%p1190_p12), [#allocation3], %s728_s5 }
  0x4b   : > { %989 = dma.done.wait (%p1139_p8), %s198_s6, 768  }
  0x4c   : > { %991 = vsyncadd (%p1139_p8), %s198_s6, 4294966528  ;;  %s208_s30 = scalar_lea.sflag [#allocation7], %s197_s14  ;;  %s1213_s18 = scalar_lea.vmem [#allocation6], %s728_s5 }
  0x4d   : > { %993 = dma.done.wait (%p1139_p8), %s208_s30, 768  }
  0x4e   : > { %995 = vsyncadd (%p1139_p8), %s208_s30, 4294966528  ;;  %s235_s0 = sand.u32 1, %s1007_s10   ;;  %p708_p2 = scmp.ne.s32.totalorder %s1027_s15, 0 }
  0x4f   : > { %s707_s29 = sshll.u32 %s235_s0, 3 }
  0x50   : > { %s1222_s7 = scalar_lea.vmem [#allocation8], %s707_s29  ;;  %247 = sbr.rel (%p708_p2) target bundleno = 87 (0x57), region = 40 }
  0x55   : > { %v1047_v0 = vmov 0.0  }
  0x56   : > { %248 = vst [vmem:[%s1222_s7] sm:$0xff] %v1047_v0 }
  0x57 PF: > { %v278_v1 = vld [vmem:[%s201_s20] sm:$0xff]  ;;  %v712_v2 = vld [vmem:[%s201_s20 + $0x10] sm:$0xff]  ;;  %v279_v7 = vld [vmem:[%s201_s20 + $0x8] sm:$0xff]  ;;  %s1048_s27 = smov 127   ;;  %s1049_s21 = smov 1   ;;  %v249_v33 = vlaneseq }
  0x58   : > { %v714_v3 = vld [vmem:[%s201_s20 + $0x20] sm:$0xff]  ;;  %v286_v4 = vmul.f32 0.299, %v278_v1  ;;  %v288_v5 = vmul.f32 0.587, %v712_v2  ;;  %v713_v8 = vld [vmem:[%s201_s20 + $0x18] sm:$0xff] }
  0x59   : > { %v292_v6 = vmul.f32 0.114, %v714_v3  ;;  %v715_v9 = vld [vmem:[%s201_s20 + $0x28] sm:$0xff]  ;;  %v287_v11 = vmul.f32 0.299, %v279_v7  ;;  %v428_v15 = vld [vmem:[%s1213_s18] sm:$0xff] }
  0x5a   : > { %v290_v10 = vadd.f32 %v288_v5, %v286_v4  ;;  %v289_v12 = vmul.f32 0.587, %v713_v8  ;;  %v293_v14 = vmul.f32 0.114, %v715_v9  ;;  %v716_v16 = vld [vmem:[%s1213_s18 + $0x10] sm:$0xff]  ;;  %v429_v17 = vld [vmem:[%s1213_s18 + $0x8] sm:$0xff] }
  0x5b   : > { %v717_v18 = vld [vmem:[%s1213_s18 + $0x18] sm:$0xff]  ;;  %v718_v19 = vld [vmem:[%s1213_s18 + $0x20] sm:$0xff]  ;;  %v436_v20 = vmul.f32 0.299, %v428_v15  ;;  %v438_v22 = vmul.f32 0.587, %v716_v16 }
  0x5c   : > { %v294_v13 = vadd.f32 %v292_v6, %v290_v10  ;;  %v291_v21 = vadd.f32 %v289_v12, %v287_v11  ;;  %v442_v23 = vmul.f32 0.114, %v718_v19  ;;  %v437_v26 = vmul.f32 0.299, %v429_v17  ;;  %v719_v29 = vld [vmem:[%s1213_s18 + $0x28] sm:$0xff]  ;;  %s709_s24 = sshll.u32 %s1027_s15, 4 }
  0x5d   : > { %v440_v24 = vadd.f32 %v438_v22, %v436_v20  ;;  %v439_v27 = vmul.f32 0.587, %v717_v18  ;;  %v443_v31 = vmul.f32 0.114, %v719_v29  ;;  %v1240_v34 = vand.u32 127, %v249_v33  ;;  %s710_s22 = sadd.s32 4294967295, %s709_s24 }
  0x5e   : > { %304 = vrot.lane.b32.xlu1 %v294_v13, %s1048_s27  ;;  %296 = vrot.lane.b32.xlu0 %v294_v13, %s1049_s21  ;;  %v295_v25 = vadd.f32 %v293_v14, %v291_v21  ;;  %v1243_v36 = vshrl.u32 %v249_v33, 7  ;;  %v314_v39 = vmul.f32 2.0, %v294_v13  ;;  %v256_v43 = vstv %s710_s22  ;;  %v842_v55 = vld [vmem:[#allocation2 + $0x1] ss:$0 sm:$0xff]  ;;  %v844_v56 = vld [vmem:[#allocation2] ss:$0 sm:$0xff] }
  0x5f   : > { %v1231_v28 = vadd.f32 %v442_v23, %v440_v24  ;;  %v441_v30 = vadd.f32 %v439_v27, %v437_v26  ;;  %vm267_vm0 = vcmp.eq.s32.totalorder %v1240_v34, 0  ;;  %vm268_vm1 = vcmp.eq.s32.totalorder %v1240_v34, 15  ;;  %v843_v59 = vld [vmem:[#allocation2 + $0x3] ss:$0 sm:$0xff]  ;;  %v845_v1 = vld [vmem:[#allocation2 + $0x2] ss:$0 sm:$0xff] }
  0x60   : > { %v251_v41 = vadd.s32 8, %v1243_v36  ;;  %v315_v45 = vmul.f32 2.0, %v295_v25  ;;  %vm259_vm2 = vcmp.eq.s32.totalorder %v1243_v36, 0  ;;  %vm261_vm3 = vcmp.eq.s32.totalorder %v1243_v36, 1  ;;  %s721_s15 = sshll.u32 %s1031_s16, 3  ;;  %s585_s16 = sshll.u32 %s1222_s7, 4  ;;  %s586_s16 = int_to_ptr.vmem [resolvable:$true] %s585_s16 }
  0x61   : > { %446 = vrot.lane.b32.xlu2 %v1231_v28, %s1049_s21  ;;  %v1235_v32 = vadd.f32 %v443_v31, %v441_v30  ;;  %v1258_v49 = vmul.f32 2.0, %v1231_v28  ;;  %vm328_vm4 = vcmp.lt.s32.totalorder %v1243_v36, 1  ;;  %v1270_v58 = vadd.s32 %v256_v43, %v1243_v36  ;;  %v468_v30 = vld [vmem:[#allocation2 + $0x9] sm:$0x1]  ;;  %v846_v31 = vld [vmem:[#allocation2 + $0x8] ss:$0 sm:$0xff]  ;;  %s583_s26 = scalar_lea.hbm %s1485_s2, %s721_s15 }
  0x62   : > { %v1255_v47 = vadd.s32 %v256_v43, %v251_v41  ;;  %vm347_vm5 = vcmp.lt.s32.totalorder %v1243_v36, 2  ;;  %s587_s8 = sshll.u32 %s583_s26, 4  ;;  %s573_s23 = scalar_lea.sflag [#allocation5], %s235_s0  ;;  %s588_s8 = int_to_ptr.hbm [resolvable:$true] %s587_s8 }
  0x63   : > { %v461_v52 = vmul.f32 2.0, %v1235_v32  ;;  %vm263_vm8 = vcmp.eq.s32.totalorder %v1270_v58, 0  ;;  %vm265_vm9 = vcmp.eq.s32.totalorder %v1270_v58, 15  ;;  %vm269_vm10 = vcmp.ge.s32.totalorder %v1270_v58, 0  ;;  %s930_s12 = sshra.s32 %s588_s8, 4  ;;  %s936_s6 = scalar_lea.hbm %s1485_s2, 16  ;;  %s931_s12 = int_to_ptr.hbm [resolvable:$true] %s930_s12 }
  0x64   : > { %vm264_vm6 = vcmp.eq.s32.totalorder %v1255_v47, 0  ;;  %vm266_vm7 = vcmp.eq.s32.totalorder %v1255_v47, 15  ;;  %vm270_vm11 = vcmp.ge.s32.totalorder %v1255_v47, 0  ;;  %vm271_vm12 = vcmp.lt.s32.totalorder %v1270_v58, 16  ;;  %s932_s28 = scalar_lea.hbm %s931_s12, 8  ;;  %p937_p10 = scmp.lt.s32.totalorder %s931_s12, %s1485_s2 }
  0x65   : > { %vm272_vm13 = vcmp.lt.s32.totalorder %v1255_v47, 16  ;;  %v1050_v58 = vmov 0.0   ;;  %p933_p8 = scmp.ne.s32.totalorder %s931_s12, %s932_s28  ;;  %p938_p11 = scmp.lt.s32.totalorder %s936_s6, %s932_s28 }
  0x66   : > { %306 = vrot.lane.b32.xlu1 %v295_v25, %s1048_s27  ;;  %298 = vrot.lane.b32.xlu0 %v295_v25, %s1049_s21 }
  0x67   : > { %p934_p4 = pnand %p933_p8, %p1154_p13  ;;  %p939_p12 = por %p938_p11, %p937_p10 }
  0x69   : > { %448 = vrot.lane.b32.xlu2 %v1235_v32, %s1049_s21  ;;  %p935_p9 = pneg %p934_p4 }
  0x6b   : > { %p940_p0 = pnand %p939_p12, %p935_p9 }
  0x6e   : > { %454 = vrot.lane.b32.xlu1 %v1235_v32, %s1048_s27  ;;  %452 = vrot.lane.b32.xlu0 %v1231_v28, %s1048_s27 }
  0xbb   : > { %v447_v35 = vpop.permute.xlu2 %446 }
  0xbc   : > { %v1280_v0 = vsel %vm267_vm0, %v1231_v28, %v447_v35 }
  0xc3   : > { %v449_v48 = vpop.permute.xlu2 %448 }
  0xc4   : > { %v451_v62 = vsel %vm267_vm0, %v1235_v32, %v449_v48 }
  0xc5   : > { %v463_v8 = vadd.f32 %v461_v52, %v451_v62 }
  0xd0   : > { %v305_v37 = vpop.permute.xlu1 %304  ;;  %v297_v38 = vpop.permute.xlu0 %296 }
  0xd1   : > { %v302_v40 = vsel %vm267_vm0, %v294_v13, %v297_v38  ;;  %v310_v42 = vsel %vm268_vm1, %v294_v13, %v305_v37  ;;  %v470_v37 = vld [vmem:[#allocation2 + $0xb] sm:$0x1]  ;;  %v847_v38 = vld [vmem:[#allocation2 + $0xa] ss:$0 sm:$0xff] }
  0xd2   : > { %v316_v44 = vadd.f32 %v314_v39, %v302_v40  ;;  %v1253_v46 = vsub.f32 %v310_v42, %v302_v40 }
  0xd4   : > { %v1263_v53 = vadd.f32 %v316_v44, %v310_v42  ;;  %v326_v63 = vrot.slane %v1253_v46, 7  ;;  %v345_v2 = vrot.slane %v1253_v46, 6 }
  0xd6   : > { %v338_v6 = vrot.slane %v1263_v53, 7  ;;  %v359_v7 = vrot.slane %v1263_v53, 6 }
  0xd8   : > { %v307_v50 = vpop.permute.xlu1 %306  ;;  %v299_v51 = vpop.permute.xlu0 %298 }
  0xd9   : > { %v311_v54 = vsel %vm268_vm1, %v295_v25, %v307_v50  ;;  %v303_v57 = vsel %vm267_vm0, %v295_v25, %v299_v51  ;;  %v477_v50 = vperm.slane %v468_v30, 0 }
  0xda   : > { %v313_v60 = vsub.f32 %v311_v54, %v303_v57  ;;  %v317_v61 = vadd.f32 %v315_v45, %v303_v57 }
  0xdc   : > { %v319_v3 = vadd.f32 %v317_v61, %v311_v54  ;;  %324 = vst [vmem:[#allocation2 - $0x6] sm:$0xc0] %v313_v60  ;;  %v327_v4 = vrot.slane %v313_v60, 7  ;;  %v346_v5 = vrot.slane %v313_v60, 6 }
  0xde   : > { %325 = vst [vmem:[#allocation2 - $0x4] sm:$0xc0] %v319_v3  ;;  %v329_v9 = vsel %vm328_vm4, %v326_v63, %v327_v4  ;;  %v330_v10 = vsel %vm328_vm4, %v327_v4, %v326_v63  ;;  %v339_v11 = vrot.slane %v319_v3, 7  ;;  %v348_v12 = vsel %vm347_vm5, %v345_v2, %v346_v5 }
  0xdf   : > { %v349_v13 = vsel %vm347_vm5, %v346_v5, %v345_v2  ;;  %v360_v14 = vrot.slane %v319_v3, 6  ;;  %v373_v15 = vsel %vm264_vm6, %v329_v9, %v348_v12  ;;  %v381_v16 = vsel %vm266_vm7, %v329_v9, %v313_v60 }
  0xe0   : > { %v340_v17 = vsel %vm328_vm4, %v338_v6, %v339_v11  ;;  %v341_v18 = vsel %vm328_vm4, %v339_v11, %v338_v6  ;;  %v354_v19 = vsel %vm261_vm3, %v842_v55, %v349_v13  ;;  %v385_v20 = vmul.f32 2.0, %v329_v9  ;;  %v455_v21 = vpop.permute.xlu1 %454  ;;  %v453_v43 = vpop.permute.xlu0 %452 }
  0xe1   : > { %v357_v22 = vsel %vm259_vm2, %v844_v56, %v354_v19  ;;  %v361_v23 = vsel %vm347_vm5, %v359_v7, %v360_v14  ;;  %v362_v24 = vsel %vm347_vm5, %v360_v14, %v359_v7  ;;  %v383_v25 = vsel %vm266_vm7, %v340_v17, %v319_v3 }
  0xe2   : > { %v363_v26 = vsel %vm261_vm3, %v843_v59, %v362_v24  ;;  %v375_v27 = vsel %vm264_vm6, %v340_v17, %v361_v23  ;;  %v387_v29 = vadd.f32 %v385_v20, %v373_v15  ;;  %v457_v33 = vsel %vm268_vm1, %v1235_v32, %v455_v21 }
  0xe3   : > { %v393_v35 = vsub.f32 %v383_v25, %v375_v27  ;;  %v1321_v39 = vsub.f32 %v457_v33, %v451_v62  ;;  %v465_v40 = vadd.f32 %v463_v8, %v457_v33  ;;  %v336_v41 = vsel %vm259_vm2, %v842_v55, %v330_v10 }
  0xe4   : > { %v389_v42 = vadd.f32 %v387_v29, %v381_v16  ;;  %v343_v44 = vsel %vm259_vm2, %v843_v59, %v341_v18  ;;  %v366_v45 = vsel %vm259_vm2, %v845_v1, %v363_v26  ;;  %v462_v32 = vadd.f32 %v1258_v49, %v1280_v0 }
  0xe5   : > { %v395_v48 = vmul.f32 0.125, %v393_v35  ;;  %471 = vst [vmem:[#allocation2 + $0x2] sm:$0xc0] %v1321_v39  ;;  %v474_v52 = vrot.slane %v1321_v39, 7  ;;  %v372_v54 = vsel %vm263_vm8, %v336_v41, %v357_v22  ;;  %v374_v55 = vsel %vm263_vm8, %v343_v44, %v366_v45 }
  0xe6   : > { %v391_v51 = vmul.f32 0.125, %v389_v42  ;;  %472 = vst [vmem:[#allocation2 + $0x4] sm:$0xc0] %v465_v40  ;;  %v382_v49 = vsel %vm265_vm9, %v343_v44, %v1263_v53  ;;  %v384_v57 = vmul.f32 2.0, %v336_v41  ;;  %v456_v59 = vsel %vm268_vm1, %v1231_v28, %v453_v43 }
  0xe7   : > { %v399_v56 = vmul.f32 %v395_v48, %v395_v48  ;;  %v392_v61 = vsub.f32 %v382_v49, %v374_v55  ;;  %v458_v62 = vsub.f32 %v456_v59, %v1280_v0  ;;  %v464_v63 = vadd.f32 %v462_v32, %v456_v59 }
  0xe8   : > { %v397_v60 = vmul.f32 %v391_v51, %v391_v51  ;;  %v481_v1 = vrot.slane %v465_v40, 7  ;;  %v488_v2 = vrot.slane %v1321_v39, 6  ;;  %v497_v3 = vrot.slane %v465_v40, 6 }
  0xe9   : > { %v386_v4 = vadd.f32 %v384_v57, %v372_v54  ;;  %v380_v5 = vsel %vm265_vm9, %v336_v41, %v1253_v46  ;;  %v394_v53 = vmul.f32 0.125, %v392_v61  ;;  %v473_v6 = vrot.slane %v458_v62, 7 }
  0xea   : > { %v480_v7 = vrot.slane %v464_v63, 7  ;;  %v484_v8 = vperm.slane %v470_v37, 0  ;;  %v487_v28 = vrot.slane %v458_v62, 6  ;;  %v496_v10 = vrot.slane %v464_v63, 6 }
  0xeb   : > { %v388_v9 = vadd.f32 %v386_v4, %v380_v5  ;;  %v401_v11 = vadd.f32 %v399_v56, %v397_v60  ;;  %v398_v12 = vmul.f32 %v394_v53, %v394_v53  ;;  %v476_v0 = vsel %vm328_vm4, %v474_v52, %v473_v6 }
  0xec   : > { %v475_v14 = vsel %vm328_vm4, %v473_v6, %v474_v52  ;;  %v482_v15 = vsel %vm328_vm4, %v480_v7, %v481_v1  ;;  %v483_v46 = vsel %vm328_vm4, %v481_v1, %v480_v7  ;;  %v478_v16 = vsel %vm259_vm2, %v477_v50, %v476_v0 }
  0xed   : > { %v390_v13 = vmul.f32 0.125, %v388_v9  ;;  %v489_v17 = vsel %vm347_vm5, %v487_v28, %v488_v2  ;;  %v490_v18 = vsel %vm347_vm5, %v488_v2, %v487_v28  ;;  %v498_v19 = vsel %vm347_vm5, %v496_v10, %v497_v3 }
  0xee   : > { %v485_v21 = vsel %vm259_vm2, %v484_v8, %v483_v46  ;;  %v491_v22 = vsel %vm261_vm3, %v477_v50, %v490_v18  ;;  %v499_v23 = vsel %vm347_vm5, %v497_v3, %v496_v10  ;;  %v1371_v24 = vadd.f32 1e-06, %v401_v11 }
  0xef   : > { %v396_v20 = vmul.f32 %v390_v13, %v390_v13  ;;  %v494_v25 = vsel %vm259_vm2, %v846_v31, %v491_v22  ;;  %v500_v26 = vsel %vm261_vm3, %v484_v8, %v499_v23  ;;  %v508_v27 = vsel %vm264_vm6, %v482_v15, %v498_v19 }
  0xf0   : > { %v503_v30 = vsel %vm259_vm2, %v847_v38, %v500_v26  ;;  %v505_v33 = vsel %vm263_vm8, %v478_v16, %v494_v25  ;;  %v506_v35 = vsel %vm264_vm6, %v475_v14, %v489_v17  ;;  %v511_v31 = vsel %vm265_vm9, %v485_v21, %v464_v63  ;;  %vm273_vm6 = vmand %vm269_vm10, %vm271_vm12 }
  0xf1   : > { %v400_v29 = vadd.f32 %v398_v12, %v396_v20  ;;  %v507_v37 = vsel %vm263_vm8, %v485_v21, %v503_v30  ;;  %v512_v41 = vsel %vm266_vm7, %v482_v15, %v465_v40  ;;  %v513_v42 = vmul.f32 2.0, %v478_v16 }
  0xf2   : > { %v514_v36 = vmul.f32 2.0, %v475_v14  ;;  %v521_v38 = vsub.f32 %v511_v31, %v507_v37  ;;  %v522_v44 = vsub.f32 %v512_v41, %v508_v27  ;;  %848 = vrsqrt.f32 %v1371_v24 }
  0xf3   : > { %v1391_v43 = vadd.f32 1e-06, %v400_v29  ;;  %v515_v45 = vadd.f32 %v513_v42, %v505_v33  ;;  %v509_v32 = vsel %vm265_vm9, %v478_v16, %v458_v62  ;;  %v510_v50 = vsel %vm266_vm7, %v475_v14, %v1321_v39  ;;  %vm274_vm7 = vmand %vm270_vm11, %vm272_vm13 }
  0xf4   : > { %v516_v48 = vadd.f32 %v514_v36, %v506_v35  ;;  %v523_v52 = vmul.f32 0.125, %v521_v38  ;;  %v524_v54 = vmul.f32 0.125, %v522_v44  ;;  %vm423_vm0 = vcmp.eq.f32.partialorder %v1371_v24, inf }
  0xf5   : > { %v517_v51 = vadd.f32 %v515_v45, %v509_v32  ;;  %850 = vrsqrt.f32 %v1391_v43  ;;  %vm411_vm14 = vcmp.eq.f32.partialorder %v1391_v43, inf  ;;  %vm413_vm15 = vcmp.eq.f32.partialorder %v1391_v43, 0.0 }
  0xf6   : > { %v518_v40 = vadd.f32 %v516_v48, %v510_v50  ;;  %v527_v59 = vmul.f32 %v523_v52, %v523_v52  ;;  %v528_v61 = vmul.f32 %v524_v54, %v524_v54  ;;  %v414_v22 = vand.u32 2147483648, %v1391_v43  ;;  %v568_v52 = vld [vmem:[%s1222_s7] sm:$0xff] }
  0xf7   : > { %v519_v55 = vmul.f32 0.125, %v517_v51  ;;  %vm425_vm1 = vcmp.eq.f32.partialorder %v1371_v24, 0.0  ;;  %v426_v26 = vand.u32 2147483648, %v1371_v24  ;;  %vm275_vm8 = vcmp.lt.s32.totalorder %v1240_v34, 16 }
  0xf8   : > { %v520_v56 = vmul.f32 0.125, %v518_v40  ;;  %v849_v49 = vpop.eup %848  ;;  %v711_v48 = vsel %vm275_vm8, 1.0, %v1050_v58 }
  0xf9   : > { %v525_v57 = vmul.f32 %v519_v55, %v519_v55  ;;  %v417_v62 = vmul.f32 %v849_v49, %v1371_v24 }
  0xfa   : > { %v526_v60 = vmul.f32 %v520_v56, %v520_v56 }
  0xfb   : > { %v851_v63 = vpop.eup %850  ;;  %v529_v1 = vadd.f32 %v527_v59, %v525_v57  ;;  %v418_v4 = vmul.f32 %v849_v49, %v417_v62 }
  0xfc   : > { %v530_v2 = vadd.f32 %v528_v61, %v526_v60  ;;  %v405_v39 = vmul.f32 %v851_v63, %v1391_v43 }
  0xfd   : > { %v531_v3 = vadd.f32 1e-06, %v529_v1  ;;  %v419_v7 = vmul.f32 0.5, %v418_v4 }
  0xfe   : > { %v532_v5 = vadd.f32 1e-06, %v530_v2  ;;  %v406_v53 = vmul.f32 %v851_v63, %v405_v39 }
  0xff   : > { %852 = vrsqrt.f32 %v531_v3  ;;  %v420_v28 = vsub.f32 1.5, %v419_v7  ;;  %vm540_vm2 = vcmp.eq.f32.partialorder %v531_v3, inf  ;;  %v543_v30 = vand.u32 2147483648, %v531_v3 }
 0x100   : > { %v407_v6 = vmul.f32 0.5, %v406_v53  ;;  %854 = vrsqrt.f32 %v532_v5  ;;  %vm542_vm3 = vcmp.eq.f32.partialorder %v531_v3, 0.0  ;;  %vm552_vm4 = vcmp.eq.f32.partialorder %v532_v5, inf }
 0x101   : > { %v421_v14 = vmul.f32 %v849_v49, %v420_v28  ;;  %v555_v37 = vand.u32 2147483648, %v532_v5  ;;  %vm554_vm5 = vcmp.eq.f32.partialorder %v532_v5, 0.0 }
 0x102   : > { %v408_v8 = vsub.f32 1.5, %v407_v6 }
 0x103   : > { %v422_v19 = vmul.f32 %v421_v14, %v1371_v24 }
 0x104   : > { %v409_v0 = vmul.f32 %v851_v63, %v408_v8 }
 0x105   : > { %v853_v9 = vpop.eup %852  ;;  %v424_v29 = vsel %vm423_vm0, %v1371_v24, %v422_v19 }
 0x106   : > { %v855_v10 = vpop.eup %854  ;;  %v534_v11 = vmul.f32 %v853_v9, %v531_v3  ;;  %v410_v17 = vmul.f32 %v409_v0, %v1391_v43  ;;  %v427_v36 = vsel %vm425_vm1, %v426_v26, %v424_v29 }
 0x107   : > { %v546_v12 = vmul.f32 %v855_v10, %v532_v5 }
 0x108   : > { %v535_v13 = vmul.f32 %v853_v9, %v534_v11  ;;  %v412_v25 = vsel %vm411_vm14, %v1391_v43, %v410_v17 }
 0x109   : > { %v547_v15 = vmul.f32 %v855_v10, %v546_v12  ;;  %v415_v31 = vsel %vm413_vm15, %v414_v22, %v412_v25 }
 0x10a   : > { %v536_v46 = vmul.f32 0.5, %v535_v13 }
 0x10b   : > { %v548_v16 = vmul.f32 0.5, %v547_v15 }
 0x10c   : > { %v537_v18 = vsub.f32 1.5, %v536_v46 }
 0x10d   : > { %v549_v20 = vsub.f32 1.5, %v548_v16 }
 0x10e   : > { %v538_v21 = vmul.f32 %v853_v9, %v537_v18 }
 0x10f   : > { %v550_v23 = vmul.f32 %v855_v10, %v549_v20 }
 0x110   : > { %v539_v27 = vmul.f32 %v538_v21, %v531_v3 }
 0x111   : > { %v551_v33 = vmul.f32 %v550_v23, %v532_v5 }
 0x112   : > { %v541_v35 = vsel %vm540_vm2, %v531_v3, %v539_v27 }
 0x113   : > { %v544_v41 = vsel %vm542_vm3, %v543_v30, %v541_v35  ;;  %v553_v42 = vsel %vm552_vm4, %v532_v5, %v551_v33 }
 0x114   : > { %v556_v38 = vsel %vm554_vm5, %v555_v37, %v553_v42  ;;  %v557_v44 = vsub.f32 %v415_v31, %v544_v41 }
 0x115   : > { %v558_v24 = vsub.f32 %v427_v36, %v556_v38 }
 0x116   : > { %v559_v43 = vand.u32 2147483647, %v557_v44 }
 0x117   : > { %v560_v45 = vand.u32 2147483647, %v558_v24 }
 0x118   : > { %v565_v32 = vsel %vm273_vm6, %v559_v43, 0.0 }
 0x119   : > { %v566_v50 = vsel %vm274_vm7, %v560_v45, 0.0 }
 0x11a   : > { %v567_v51 = vadd.f32 %v566_v50, %v565_v32 }
 0x11c   : > { %v569_v47 = vmul.f32 %v711_v48, %v567_v51 }
 0x11e   : > { %v570_v40 = vadd.f32 %v569_v47, %v568_v52 }
 0x120   : > { %571 = vst [vmem:[%s1222_s7] sm:$0xff] %v570_v40 }
 0x121   : > { %943 = shalt.err (!%p940_p0)
}
 0x122   : > { %733 = dma.vmem_to_hbm [thread:$0]  (%p1154_p13), %s586_s16, 128, %s588_s8, %s573_s23  }
 0x123 PF: > { %p747_p3 = scmp.ge.s32.totalorder %s1043_s19, 2  ;;  %s599_s18 = sand.u32 1, %s1003_s9  }
 0x124   : > { %s600_s0 = scalar_lea.sflag [#allocation5], %s599_s18 }
 0x125   : > { %p743_p5 = pnand %p747_p3, %p1159_p1 }
 0x127   : > { %p744_p6 = pneg %p743_p5 }
 0x129   : > { %997 = dma.done.wait (%p744_p6), %s600_s0, 128  }
 0x12a   : > { %999 = vsyncadd (%p744_p6), %s600_s0, 4294967168  ;;  %s21_s19 = sadd.s32 1, %s1043_s19   ;;  %s1505_s29 = sld [smem:[#allocation18_spill]] }
 0x12b   : > { %p18_p7 = scmp.ge.s32.totalorder %s21_s19, 6   ;;  %s1506_s3 = sld [smem:[#allocation12_spill]] }
 0x12c   : > { %s1507_s14 = sld [smem:[#allocation17_spill]]  ;;  %s1512_s9 = smov %s1007_s10 }
 0x12d   : > { %s1508_s15 = sld [smem:[#allocation13_spill]]  ;;  %s1513_s10 = smov %s1011_s11 }
 0x12e   : > { %s1509_s16 = sld [smem:[#allocation14_spill]]  ;;  %s1515_s12 = smov %s1019_s13 }
 0x12f   : > { %s1510_s17 = sld [smem:[#allocation15_spill]]  ;;  %20 = sbr.rel (!%p18_p7) target bundleno = 13 (0xd), region = 95 }
 0x130   : > { %s1511_s18 = sld [smem:[#allocation16_spill]]  ;;  %s1514_s11 = smov %s1505_s29 }
 0x131   : > { %s1516_s13 = smov %s1506_s3 }
 0x134   :  { %606 = vsyncpa [#allocation4], 1 }
 0x135   :  { %608 = vsyncpa [#allocation4 + $0x1], 1 }
 0x136   :  { %609 = vsyncpa [#allocation7], 1 }
 0x137   :  { %611 = vsyncpa [#allocation7 + $0x1], 1 }
 0x138   :  { %612 = vsyncpa [#allocation5], 1 }
 0x139   :  { %614 = vsyncpa [#allocation5 + $0x1], 1 }

</bundles_post_ra>
